<compile_context>
chip_gen: v5e
topology: v5e:2x2
jax: 0.10.0
libtpu: 0.0.40
codegen_flags: <defaults>
</compile_context>

<pallas_src>
import functools

import jax
import jax.numpy as jnp
from jax import lax
from jax.experimental import pallas as pl
from jax.experimental.pallas import tpu as pltpu


# ----------------------------- fused Pallas kernel -----------------------------

def _single_couple_kernel(x1p_ref, x2_ref, bn1b_ref, w1_ref, wc1_ref,
                          bn2b_ref, w2_ref, wc2_ref, mask_ref,
                          res1_ref, res2_ref, *, wo):
    """Whole SingleCouple forward for one group of images.

      x1p_ref : (1, 4*Cin, L)    x1 parity planes (ee,eo,oe,oo) stacked on channels; L = bn*Ho*Wo
      x2_ref  : (1, Cin, L)      x2 (already at Ho x Wo)
      bn1b_ref: (4*Cin, 2)       bn1_b affine [scale | shift], tiled over the 4 parity planes
      w1_ref  : (4*inter, 4*Cin+1)  block-diag conv1_b (bn1 scale folded) | bn1 shift column
      wc1_ref : (4*G, 4*inter)   conv1 3x3 taps fused: row blocks = shift groups {0,+1,+wo,+wo+1}
      bn2b_ref: (Cin+G, 2)       bn2_b affine
      w2_ref  : (inter, Cin+G+1) conv2_b (bn2 scale folded) | bn2 shift column
      wc2_ref : (9*G, inter)     deconv2 taps fused: row blocks = (plane, shift) groups
      mask_ref: (6, L)           [ow!=0, oh!=0, both, ow!=Wo-1, oh!=Ho-1, both] per lane
      res1_ref: (1, Cin+G, L)    out: cat(conv1(...), x2)
      res2_ref: (1, 4, Cin+G, L) out: cat(deconv2(...), x1) as 4 sub-pixel parity planes
    """
    f32 = jnp.float32
    lg = x2_ref.shape[-1]
    cin = x2_ref.shape[1]
    c4 = 4 * cin
    G = wc1_ref.shape[0] // 4
    cg = cin + G

    m_w0 = mask_ref[0:1, :]        # kills taps that crossed the ow == 0 edge
    m_h0 = mask_ref[1:2, :]        # kills taps that crossed the oh == 0 edge
    m_00 = mask_ref[2:3, :]        # both of the above
    m_wl = mask_ref[3:4, :]        # ow == Wo-1 edge
    m_hl = mask_ref[4:5, :]        # oh == Ho-1 edge
    m_ll = mask_ref[5:6, :]        # both

    def rollm(t, s, m):
        # out[:, j] = t[:, j - s]; the roll wraps (lane rotate on the XLU) and the mask makes
        # it behave like zero padding at image / row / column edges.
        return pltpu.roll(t, s % lg, axis=1) * m

    # ---- branch 1: relu(bn1_b) -> conv1_b (1x1) -> relu(bn1) -> conv1 (3x3 stride 2) ----
    x1p = x1p_ref[0]                                                       # (4*cin, L)
    a1 = jnp.maximum(x1p * bn1b_ref[:, 0:1] + bn1b_ref[:, 1:2], 0.0)
    b1 = jnp.dot(w1_ref[:, :c4], a1, preferred_element_type=f32) + w1_ref[:, c4:c4 + 1]
    b1 = jnp.maximum(b1, 0.0)                                              # (4*inter, L)

    c1 = jnp.dot(wc1_ref[...], b1, preferred_element_type=f32)             # (4*G, L)
    r1 = (c1[0:G]                                                          # unshifted taps
          + rollm(c1[G:2 * G], 1, m_w0)                                    # needs [oh, ow-1]
          + rollm(c1[2 * G:3 * G], wo, m_h0)                               # needs [oh-1, ow]
          + rollm(c1[3 * G:4 * G], wo + 1, m_00))                          # needs [oh-1, ow-1]

    x2v = x2_ref[0]                                                        # (cin, L)
    res1_ref[0, :G, :] = r1                                                # res1 = cat(r1, x2)
    res1_ref[0, G:, :] = x2v

    # ---- branch 2: relu(bn2_b) -> conv2_b (1x1) -> relu(bn2) -> deconv2 (3x3 stride 2) ----
    a2r = jnp.maximum(r1 * bn2b_ref[:G, 0:1] + bn2b_ref[:G, 1:2], 0.0)
    a2x = jnp.maximum(x2v * bn2b_ref[G:, 0:1] + bn2b_ref[G:, 1:2], 0.0)
    b2 = (jnp.dot(w2_ref[:, :G], a2r, preferred_element_type=f32)
          + jnp.dot(w2_ref[:, G:cg], a2x, preferred_element_type=f32)
          + w2_ref[:, cg:cg + 1])
    b2 = jnp.maximum(b2, 0.0)                                              # (inter, L)

    d = jnp.dot(wc2_ref[...], b2, preferred_element_type=f32)              # (9*G, L)
    r2_ee = d[0:G]
    r2_eo = d[G:2 * G] + rollm(d[4 * G:5 * G], -1, m_wl)
    r2_oe = d[2 * G:3 * G] + rollm(d[6 * G:7 * G], -wo, m_hl)
    r2_oo = (d[3 * G:4 * G]
             + rollm(d[5 * G:6 * G], -1, m_wl)
             + rollm(d[7 * G:8 * G], -wo, m_hl)
             + rollm(d[8 * G:9 * G], -(wo + 1), m_ll))

    # res2 = cat(deconv2(...), x1) emitted as 4 parity planes; x1 copy done here so the
    # wrapper needs no separate concatenation pass over res2.
    r2_planes = (r2_ee, r2_eo, r2_oe, r2_oo)
    for p in range(4):
        res2_ref[0, p, :G, :] = r2_planes[p]
        res2_ref[0, p, G:, :] = x1p[p * cin:(p + 1) * cin]


# ----------------------------- parameter packing -----------------------------

def _pack_kernel_params(p):
    """Fold the post-1x1 BatchNorms into the 1x1 weights and pre-stack the 3x3 / transposed-3x3
    taps into single fused matmul weights (shift groups stacked on the M / K axes)."""
    inter, cin = p['w_conv1_b'].shape
    G = p['w_conv1'].shape[0]
    cg = cin + G

    # bn1_b affine, tiled over the 4 parity planes (rows are parity-major, channel-minor).
    bn1b = jnp.tile(jnp.stack([p['bn1_b_scale'], p['bn1_b_shift']], axis=1), (4, 1))

    # conv1_b with bn1 scale folded, block-diagonal over the 4 parity planes; bn1 shift as bias.
    w1f = p['w_conv1_b'] * p['bn1_scale'][:, None]                        # (inter, cin)
    w1 = jnp.kron(jnp.eye(4, dtype=w1f.dtype), w1f)                       # (4*inter, 4*cin)
    w1 = jnp.concatenate([w1, jnp.tile(p['bn1_shift'], 4)[:, None]], axis=1)

    # conv1 3x3 stride-2 taps fused into one (4G, 4*inter) weight.
    #   column blocks = input parity plane [ee, eo, oe, oo]
    #   row blocks    = output shift group [none, +1 (ow-1), +wo (oh-1), +wo+1 (oh-1,ow-1)]
    W = lambda kh, kw: p['w_conv1'][:, :, kh, kw]                         # (G, inter)
    Z = jnp.zeros((G, inter), p['w_conv1'].dtype)
    wc1 = jnp.block([
        [W(1, 1), W(1, 2), W(2, 1), W(2, 2)],
        [Z,       W(1, 0), Z,       W(2, 0)],
        [Z,       Z,       W(0, 1), W(0, 2)],
        [Z,       Z,       Z,       W(0, 0)],
    ])

    bn2b = jnp.stack([p['bn2_b_scale'], p['bn2_b_shift']], axis=1)        # (cg, 2)

    w2f = p['w_conv2_b'] * p['bn2_scale'][:, None]                        # (inter, cg)
    w2 = jnp.concatenate([w2f, p['bn2_shift'][:, None]], axis=1)          # (inter, cg+1)

    # deconv2 (ConvTranspose, PyTorch weight (inter, G, 3, 3)) taps fused into (9G, inter):
    #   row blocks = [ee, eo, oe, oo (shift 0), eo(-1), oo(-1), oe(-wo), oo(-wo), oo(-wo-1)]
    D = lambda kh, kw: p['w_deconv2'][:, :, kh, kw].T                     # (G, inter)
    wc2 = jnp.concatenate([D(1, 1), D(1, 2), D(2, 1), D(2, 2),
                           D(1, 0), D(2, 0), D(0, 1), D(0, 2), D(0, 0)], axis=0)

    return dict(bn1b=bn1b, w1=w1, wc1=wc1, bn2b=bn2b, w2=w2, wc2=wc2)


def _pick_group(n, hw, target_lanes=128):
    """Images packed along the lane axis per grid step (lane-dense blocks, fewer grid steps)."""
    if hw >= target_lanes:
        return 1
    best = 1
    for d in range(1, n + 1):
        if n % d == 0 and d * hw <= target_lanes:
            best = d
    return best


# ----------------------------- SingleCouple forward (NCHW, PyTorch-style) -----------------------------

def single_couple_forward_nchw(x, params):
    """x = (x1, x2, x3, x4, pred) with x1:(N,C,H,W), x2:(N,C,H/2,W/2) NCHW; pred: python list."""
    x1, x2, _x3, _x4, pred = x
    n, cin, h, w = x1.shape
    assert h % 2 == 0 and w % 2 == 0, 'SingleCouple needs even spatial dims'
    ho, wo = h // 2, w // 2
    hw = ho * wo
    assert x2.shape == (n, cin, ho, wo)

    kp = _pack_kernel_params(params)
    inter = kp['w2'].shape[0]
    growth = kp['wc1'].shape[0] // 4
    cg = cin + growth
    c4 = 4 * cin

    bn = _pick_group(n, hw)        # images per grid step (lane axis = bn*hw)
    ng = n // bn
    lg = bn * hw

    # x1 -> (ng, 4*cin, lg): parity-major / channel-minor rows; lane = (img_in_group, oh, ow).
    x1p = x1.reshape(ng, bn, cin, ho, 2, wo, 2)
    x1p = jnp.transpose(x1p, (0, 4, 6, 2, 1, 3, 5)).reshape(ng, c4, lg)
    # x2 -> (ng, cin, lg)
    x2p = jnp.transpose(x2.reshape(ng, bn, cin, ho, wo), (0, 2, 1, 3, 4)).reshape(ng, cin, lg)

    # per-lane edge masks (also kill cross-image wrap of the in-kernel lane rolls).
    pix = jnp.arange(lg, dtype=jnp.int32) % hw
    oh_i = pix // wo
    ow_i = pix % wo
    m_w0 = (ow_i != 0).astype(jnp.float32)
    m_h0 = (oh_i != 0).astype(jnp.float32)
    m_wl = (ow_i != wo - 1).astype(jnp.float32)
    m_hl = (oh_i != ho - 1).astype(jnp.float32)
    masks = jnp.stack([m_w0, m_h0, m_w0 * m_h0, m_wl, m_hl, m_wl * m_hl], axis=0)   # (6, lg)

    kernel = functools.partial(_single_couple_kernel, wo=wo)
    res1p, res2p = pl.pallas_call(
        kernel,
        grid=(ng,),
        in_specs=[
            pl.BlockSpec((1, c4, lg), lambda i: (i, 0, 0)),
            pl.BlockSpec((1, cin, lg), lambda i: (i, 0, 0)),
            pl.BlockSpec((c4, 2), lambda i: (0, 0)),
            pl.BlockSpec((4 * inter, c4 + 1), lambda i: (0, 0)),
            pl.BlockSpec((4 * growth, 4 * inter), lambda i: (0, 0)),
            pl.BlockSpec((cg, 2), lambda i: (0, 0)),
            pl.BlockSpec((inter, cg + 1), lambda i: (0, 0)),
            pl.BlockSpec((9 * growth, inter), lambda i: (0, 0)),
            pl.BlockSpec((6, lg), lambda i: (0, 0)),
        ],
        out_specs=[
            pl.BlockSpec((1, cg, lg), lambda i: (i, 0, 0)),
            pl.BlockSpec((1, 4, cg, lg), lambda i: (i, 0, 0, 0)),
        ],
        out_shape=[
            jax.ShapeDtypeStruct((ng, cg, lg), jnp.float32),
            jax.ShapeDtypeStruct((ng, 4, cg, lg), jnp.float32),
        ],
        compiler_params=pltpu.CompilerParams(
            dimension_semantics=("parallel",),       # shards image-groups across TensorCores
            vmem_limit_bytes=32 * 1024 * 1024,       # tiny working set, fits every generation
        ),
    )(x1p, x2p, kp['bn1b'], kp['w1'], kp['wc1'], kp['bn2b'], kp['w2'], kp['wc2'], masks)

    # res1 back to NCHW (cat with x2 already done in-kernel).
    res1 = jnp.transpose(res1p.reshape(ng, cg, bn, ho, wo), (0, 2, 1, 3, 4)).reshape(n, cg, ho, wo)
    # res2: interleave the 4 parity planes back to full resolution (x1 cat already done in-kernel).
    res2 = res2p.reshape(ng, 2, 2, cg, bn, ho, wo)
    res2 = jnp.transpose(res2, (0, 4, 3, 5, 1, 6, 2)).reshape(n, cg, h, w)

    out = None                                       # classify == 0
    pred = list(pred) + [out]                        # no in-place mutation of the caller's list
    # after=True, down=False  ->  (res2, res1, None, None, pred)
    return res2, res1, None, None, pred


# ----------------------------- deterministic params -----------------------------

def init_params(key, indepth, growth, bottle=4, eps=1e-5):
    inter = int(bottle * growth)
    keys = jax.random.split(key, 8)

    def bn_affine(k, c):
        kg, kb, km, kv = jax.random.split(k, 4)
        gamma = 1.0 + 0.1 * jax.random.normal(kg, (c,), jnp.float32)
        beta = 0.1 * jax.random.normal(kb, (c,), jnp.float32)
        mean = 0.1 * jax.random.normal(km, (c,), jnp.float32)
        var = 0.5 + 0.5 * jax.random.uniform(kv, (c,), jnp.float32)
        scale = gamma / jnp.sqrt(var + eps)
        return scale, beta - mean * scale

    bn1_b_scale, bn1_b_shift = bn_affine(keys[0], indepth)
    bn1_scale, bn1_shift = bn_affine(keys[1], inter)
    bn2_b_scale, bn2_b_shift = bn_affine(keys[2], indepth + growth)
    bn2_scale, bn2_shift = bn_affine(keys[3], inter)

    # PyTorch-native layouts:
    w_conv1_b = 0.2 * jax.random.normal(keys[4], (inter, indepth), jnp.float32)           # (out, in)
    w_conv1 = 0.2 * jax.random.normal(keys[5], (growth, inter, 3, 3), jnp.float32)        # OIHW
    w_conv2_b = 0.2 * jax.random.normal(keys[6], (inter, indepth + growth), jnp.float32)  # (out, in)
    w_deconv2 = 0.2 * jax.random.normal(keys[7], (inter, growth, 3, 3), jnp.float32)      # (in, out, kh, kw)

    return dict(bn1_b_scale=bn1_b_scale, bn1_b_shift=bn1_b_shift,
                bn1_scale=bn1_scale, bn1_shift=bn1_shift,
                bn2_b_scale=bn2_b_scale, bn2_b_shift=bn2_b_shift,
                bn2_scale=bn2_scale, bn2_shift=bn2_shift,
                w_conv1_b=w_conv1_b, w_conv1=w_conv1,
                w_conv2_b=w_conv2_b, w_deconv2=w_deconv2)


# ----------------------------- pure-JAX reference (sanity check) -----------------------------

def reference_forward_nhwc(x1, x2, p):
    hi = lax.Precision.HIGHEST

    def bnrelu(v, s, b):
        return jnp.maximum(v * s + b, 0.0)

    a = bnrelu(x1, p['bn1_b_scale'], p['bn1_b_shift'])
    a = jnp.einsum('nhwc,oc->nhwo', a, p['w_conv1_b'], precision=hi)
    a = bnrelu(a, p['bn1_scale'], p['bn1_shift'])
    w1_hwio = jnp.transpose(p['w_conv1'], (2, 3, 1, 0))
    r1 = lax.conv_general_dilated(a, w1_hwio, (2, 2), ((1, 1), (1, 1)),
                                  dimension_numbers=('NHWC', 'HWIO', 'NHWC'), precision=hi)
    res1 = jnp.concatenate([r1, x2], axis=-1)

    a = bnrelu(res1, p['bn2_b_scale'], p['bn2_b_shift'])
    a = jnp.einsum('nhwc,oc->nhwo', a, p['w_conv2_b'], precision=hi)
    a = bnrelu(a, p['bn2_scale'], p['bn2_shift'])
    # ConvTranspose2d(3, stride=2, padding=1, output_padding=1) == lhs-dilated conv, flipped taps.
    wd_hwio = jnp.transpose(jnp.flip(p['w_deconv2'], axis=(2, 3)), (2, 3, 0, 1))
    r2 = lax.conv_general_dilated(a, wd_hwio, (1, 1), ((1, 2), (1, 2)),
                                  lhs_dilation=(2, 2),
                                  dimension_numbers=('NHWC', 'HWIO', 'NHWC'), precision=hi)
    res2 = jnp.concatenate([r2, x1], axis=-1)
    return res2, res1


# ----------------------------- main -----------------------------

if __name__ == "__main__":
    key = jax.random.PRNGKey(0)
    k_p, k_x1, k_x2 = jax.random.split(key, 3)

    # N=4 so that (a) 2 images pack into one 128-lane block and (b) the grid still has
    # 2 "parallel" steps for the two v7x TensorCores.
    N, C, H, W = 4, 4, 16, 16      # indepth = 4
    G = 4                          # growth = 4, bottle = 4 -> interdepth = 16

    params = init_params(k_p, indepth=C, growth=G, bottle=4)

    # PyTorch-style NCHW inputs: x1 full resolution, x2 half resolution (matches the cat shapes).
    x1_nchw = jax.random.normal(k_x1, (N, C, H, W), jnp.float32)
    x2_nchw = jax.random.normal(k_x2, (N, C, H // 2, W // 2), jnp.float32)
    pred = []

    res2, res1, n3, n4, pred_out = single_couple_forward_nchw(
        (x1_nchw, x2_nchw, None, None, pred), params)
    jax.block_until_ready((res2, res1))

    # shape / semantics checks against a pure-JAX reference
    assert res2.shape == (N, C + G, H, W)
    assert res1.shape == (N, C + G, H // 2, W // 2)
    assert n3 is None and n4 is None and pred_out == [None]

    x1_nhwc = jnp.transpose(x1_nchw, (0, 2, 3, 1))
    x2_nhwc = jnp.transpose(x2_nchw, (0, 2, 3, 1))
    ref2, ref1 = reference_forward_nhwc(x1_nhwc, x2_nhwc, params)
    ref2 = jnp.transpose(ref2, (0, 3, 1, 2))
    ref1 = jnp.transpose(ref1, (0, 3, 1, 2))
    # Tolerance sized for MXU fp32 multi-pass rounding differences; any tap/shift/mask bug
    # produces O(1) errors and is caught.
    err1 = float(jnp.max(jnp.abs(res1 - ref1)))
    err2 = float(jnp.max(jnp.abs(res2 - ref2)))
    assert jnp.allclose(res1, ref1, atol=5e-3, rtol=5e-3), err1
    assert jnp.allclose(res2, ref2, atol=5e-3, rtol=5e-3), err2

    print("KERNEL_OK")
</pallas_src>

<mosaic_0001>
module attributes {stable_mosaic.version = 11 : i64} {
  func.func @_single_couple_kernel(%arg0: i32, %arg1: memref<1x16x128xf32, #tpu.memory_space<vmem>>, %arg2: memref<1x4x128xf32, #tpu.memory_space<vmem>>, %arg3: memref<16x2xf32, #tpu.memory_space<vmem>>, %arg4: memref<64x17xf32, #tpu.memory_space<vmem>>, %arg5: memref<16x64xf32, #tpu.memory_space<vmem>>, %arg6: memref<8x2xf32, #tpu.memory_space<vmem>>, %arg7: memref<16x9xf32, #tpu.memory_space<vmem>>, %arg8: memref<36x16xf32, #tpu.memory_space<vmem>>, %arg9: memref<6x128xf32, #tpu.memory_space<vmem>>, %arg10: memref<1x8x128xf32, #tpu.memory_space<vmem>>, %arg11: memref<1x4x8x128xf32, #tpu.memory_space<vmem>>) attributes {dimension_semantics = [#tpu.dimension_semantics<parallel>], iteration_bounds = array<i64: 2>, scalar_prefetch = 0 : i64, scratch_operands = 0 : i64, tpu.core_type = #tpu.core_type<tc>, window_params = [{transform_indices = @transform_0, window_bounds = array<i64: 1, 16, 128>}, {transform_indices = @transform_1, window_bounds = array<i64: 1, 4, 128>}, {pipeline_mode = #tpu.pipeline_mode<synchronous>, transform_indices = @transform_2, window_bounds = array<i64: 16, 2>}, {pipeline_mode = #tpu.pipeline_mode<synchronous>, transform_indices = @transform_3, window_bounds = array<i64: 64, 17>}, {pipeline_mode = #tpu.pipeline_mode<synchronous>, transform_indices = @transform_4, window_bounds = array<i64: 16, 64>}, {pipeline_mode = #tpu.pipeline_mode<synchronous>, transform_indices = @transform_5, window_bounds = array<i64: 8, 2>}, {pipeline_mode = #tpu.pipeline_mode<synchronous>, transform_indices = @transform_6, window_bounds = array<i64: 16, 9>}, {pipeline_mode = #tpu.pipeline_mode<synchronous>, transform_indices = @transform_7, window_bounds = array<i64: 36, 16>}, {pipeline_mode = #tpu.pipeline_mode<synchronous>, transform_indices = @transform_8, window_bounds = array<i64: 6, 128>}, {transform_indices = @transform_9, window_bounds = array<i64: 1, 8, 128>}, {transform_indices = @transform_10, window_bounds = array<i64: 1, 4, 8, 128>}]} {
    %c0 = arith.constant 0 : index
    %c0_0 = arith.constant 0 : index
    %0 = vector.load %arg9[%c0, %c0_0] : memref<6x128xf32, #tpu.memory_space<vmem>>, vector<1x128xf32>
    %c1 = arith.constant 1 : index
    %c0_1 = arith.constant 0 : index
    %1 = vector.load %arg9[%c1, %c0_1] : memref<6x128xf32, #tpu.memory_space<vmem>>, vector<1x128xf32>
    %c2 = arith.constant 2 : index
    %c0_2 = arith.constant 0 : index
    %2 = vector.load %arg9[%c2, %c0_2] : memref<6x128xf32, #tpu.memory_space<vmem>>, vector<1x128xf32>
    %c3 = arith.constant 3 : index
    %c0_3 = arith.constant 0 : index
    %3 = vector.load %arg9[%c3, %c0_3] : memref<6x128xf32, #tpu.memory_space<vmem>>, vector<1x128xf32>
    %c4 = arith.constant 4 : index
    %c0_4 = arith.constant 0 : index
    %4 = vector.load %arg9[%c4, %c0_4] : memref<6x128xf32, #tpu.memory_space<vmem>>, vector<1x128xf32>
    %c5 = arith.constant 5 : index
    %c0_5 = arith.constant 0 : index
    %5 = vector.load %arg9[%c5, %c0_5] : memref<6x128xf32, #tpu.memory_space<vmem>>, vector<1x128xf32>
    %c0_6 = arith.constant 0 : index
    %c0_7 = arith.constant 0 : index
    %c0_8 = arith.constant 0 : index
    %6 = vector.load %arg1[%c0_6, %c0_7, %c0_8] : memref<1x16x128xf32, #tpu.memory_space<vmem>>, vector<1x16x128xf32>
    %7 = vector.shape_cast %6 : vector<1x16x128xf32> to vector<16x128xf32>
    %c0_9 = arith.constant 0 : index
    %c0_10 = arith.constant 0 : index
    %8 = vector.load %arg3[%c0_9, %c0_10] : memref<16x2xf32, #tpu.memory_space<vmem>>, vector<16x1xf32>
    %9 = vector.broadcast %8 : vector<16x1xf32> to vector<16x128xf32>
    %10 = arith.mulf %7, %9 : vector<16x128xf32>
    %c0_11 = arith.constant 0 : index
    %c1_12 = arith.constant 1 : index
    %11 = vector.load %arg3[%c0_11, %c1_12] : memref<16x2xf32, #tpu.memory_space<vmem>>, vector<16x1xf32>
    %12 = vector.broadcast %11 : vector<16x1xf32> to vector<16x128xf32>
    %13 = arith.addf %10, %12 : vector<16x128xf32>
    %cst = arith.constant 0.000000e+00 : f32
    %14 = vector.broadcast %cst : f32 to vector<16x128xf32>
    %15 = arith.maximumf %13, %14 : vector<16x128xf32>
    %c0_13 = arith.constant 0 : index
    %c0_14 = arith.constant 0 : index
    %16 = vector.load %arg4[%c0_13, %c0_14] : memref<64x17xf32, #tpu.memory_space<vmem>>, vector<64x16xf32>
    %cst_15 = arith.constant dense<0.000000e+00> : vector<64x128xf32>
    %17 = tpu.matmul %16, %15, %cst_15 {dimension_numbers = #tpu.dot_dimension_numbers<[1], [0], [0], [1], [0, 0, 1, 1], [], []>} : vector<64x16xf32>, vector<16x128xf32>, vector<64x128xf32> -> vector<64x128xf32>
    %c0_16 = arith.constant 0 : index
    %c16 = arith.constant 16 : index
    %18 = vector.load %arg4[%c0_16, %c16] : memref<64x17xf32, #tpu.memory_space<vmem>>, vector<64x1xf32>
    %19 = vector.broadcast %18 : vector<64x1xf32> to vector<64x128xf32>
    %20 = arith.addf %17, %19 : vector<64x128xf32>
    %cst_17 = arith.constant 0.000000e+00 : f32
    %21 = vector.broadcast %cst_17 : f32 to vector<64x128xf32>
    %22 = arith.maximumf %20, %21 : vector<64x128xf32>
    %c0_18 = arith.constant 0 : index
    %c0_19 = arith.constant 0 : index
    %23 = vector.load %arg5[%c0_18, %c0_19] : memref<16x64xf32, #tpu.memory_space<vmem>>, vector<16x64xf32>
    %cst_20 = arith.constant dense<0.000000e+00> : vector<16x128xf32>
    %24 = tpu.matmul %23, %22, %cst_20 {dimension_numbers = #tpu.dot_dimension_numbers<[1], [0], [0], [1], [0, 0, 1, 1], [], []>} : vector<16x64xf32>, vector<64x128xf32>, vector<16x128xf32> -> vector<16x128xf32>
    %25 = vector.extract_strided_slice %24 {offsets = [0, 0], sizes = [4, 128], strides = [1, 1]} : vector<16x128xf32> to vector<4x128xf32>
    %26 = vector.extract_strided_slice %24 {offsets = [4, 0], sizes = [4, 128], strides = [1, 1]} : vector<16x128xf32> to vector<4x128xf32>
    %c1_i32 = arith.constant 1 : i32
    %27 = tpu.dynamic_rotate %26 by %c1_i32 dim 1 : vector<4x128xf32>, i32 -> vector<4x128xf32>
    %28 = vector.broadcast %0 : vector<1x128xf32> to vector<4x128xf32>
    %29 = arith.mulf %27, %28 : vector<4x128xf32>
    %30 = arith.addf %25, %29 : vector<4x128xf32>
    %31 = vector.extract_strided_slice %24 {offsets = [8, 0], sizes = [4, 128], strides = [1, 1]} : vector<16x128xf32> to vector<4x128xf32>
    %c8_i32 = arith.constant 8 : i32
    %32 = tpu.dynamic_rotate %31 by %c8_i32 dim 1 : vector<4x128xf32>, i32 -> vector<4x128xf32>
    %33 = vector.broadcast %1 : vector<1x128xf32> to vector<4x128xf32>
    %34 = arith.mulf %32, %33 : vector<4x128xf32>
    %35 = arith.addf %30, %34 : vector<4x128xf32>
    %36 = vector.extract_strided_slice %24 {offsets = [12, 0], sizes = [4, 128], strides = [1, 1]} : vector<16x128xf32> to vector<4x128xf32>
    %c9_i32 = arith.constant 9 : i32
    %37 = tpu.dynamic_rotate %36 by %c9_i32 dim 1 : vector<4x128xf32>, i32 -> vector<4x128xf32>
    %38 = vector.broadcast %2 : vector<1x128xf32> to vector<4x128xf32>
    %39 = arith.mulf %37, %38 : vector<4x128xf32>
    %40 = arith.addf %35, %39 : vector<4x128xf32>
    %c0_21 = arith.constant 0 : index
    %c0_22 = arith.constant 0 : index
    %c0_23 = arith.constant 0 : index
    %41 = vector.load %arg2[%c0_21, %c0_22, %c0_23] : memref<1x4x128xf32, #tpu.memory_space<vmem>>, vector<1x4x128xf32>
    %42 = vector.shape_cast %41 : vector<1x4x128xf32> to vector<4x128xf32>
    %c0_24 = arith.constant 0 : index
    %c0_25 = arith.constant 0 : index
    %c0_26 = arith.constant 0 : index
    %43 = vector.load %arg10[%c0_24, %c0_25, %c0_26] : memref<1x8x128xf32, #tpu.memory_space<vmem>>, vector<1x4x128xf32>
    %44 = vector.shape_cast %43 : vector<1x4x128xf32> to vector<4x128xf32>
    %45 = vector.shape_cast %40 : vector<4x128xf32> to vector<1x4x128xf32>
    tpu.vector_store %arg10[%c0_24, %c0_25, %c0_26], %45 {strides = array<i32>} : memref<1x8x128xf32, #tpu.memory_space<vmem>>, vector<1x4x128xf32>,
    %c0_27 = arith.constant 0 : index
    %c4_28 = arith.constant 4 : index
    %c0_29 = arith.constant 0 : index
    %46 = vector.load %arg10[%c0_27, %c4_28, %c0_29] : memref<1x8x128xf32, #tpu.memory_space<vmem>>, vector<1x4x128xf32>
    %47 = vector.shape_cast %46 : vector<1x4x128xf32> to vector<4x128xf32>
    %48 = vector.shape_cast %42 : vector<4x128xf32> to vector<1x4x128xf32>
    tpu.vector_store %arg10[%c0_27, %c4_28, %c0_29], %48 {strides = array<i32>} : memref<1x8x128xf32, #tpu.memory_space<vmem>>, vector<1x4x128xf32>,
    %c0_30 = arith.constant 0 : index
    %c0_31 = arith.constant 0 : index
    %49 = vector.load %arg6[%c0_30, %c0_31] : memref<8x2xf32, #tpu.memory_space<vmem>>, vector<4x1xf32>
    %50 = vector.broadcast %49 : vector<4x1xf32> to vector<4x128xf32>
    %51 = arith.mulf %40, %50 : vector<4x128xf32>
    %c0_32 = arith.constant 0 : index
    %c1_33 = arith.constant 1 : index
    %52 = vector.load %arg6[%c0_32, %c1_33] : memref<8x2xf32, #tpu.memory_space<vmem>>, vector<4x1xf32>
    %53 = vector.broadcast %52 : vector<4x1xf32> to vector<4x128xf32>
    %54 = arith.addf %51, %53 : vector<4x128xf32>
    %cst_34 = arith.constant 0.000000e+00 : f32
    %55 = vector.broadcast %cst_34 : f32 to vector<4x128xf32>
    %56 = arith.maximumf %54, %55 : vector<4x128xf32>
    %c4_35 = arith.constant 4 : index
    %c0_36 = arith.constant 0 : index
    %57 = vector.load %arg6[%c4_35, %c0_36] : memref<8x2xf32, #tpu.memory_space<vmem>>, vector<4x1xf32>
    %58 = vector.broadcast %57 : vector<4x1xf32> to vector<4x128xf32>
    %59 = arith.mulf %42, %58 : vector<4x128xf32>
    %c4_37 = arith.constant 4 : index
    %c1_38 = arith.constant 1 : index
    %60 = vector.load %arg6[%c4_37, %c1_38] : memref<8x2xf32, #tpu.memory_space<vmem>>, vector<4x1xf32>
    %61 = vector.broadcast %60 : vector<4x1xf32> to vector<4x128xf32>
    %62 = arith.addf %59, %61 : vector<4x128xf32>
    %cst_39 = arith.constant 0.000000e+00 : f32
    %63 = vector.broadcast %cst_39 : f32 to vector<4x128xf32>
    %64 = arith.maximumf %62, %63 : vector<4x128xf32>
    %c0_40 = arith.constant 0 : index
    %c0_41 = arith.constant 0 : index
    %65 = vector.load %arg7[%c0_40, %c0_41] : memref<16x9xf32, #tpu.memory_space<vmem>>, vector<16x4xf32>
    %cst_42 = arith.constant dense<0.000000e+00> : vector<16x128xf32>
    %66 = tpu.matmul %65, %56, %cst_42 {dimension_numbers = #tpu.dot_dimension_numbers<[1], [0], [0], [1], [0, 0, 1, 1], [], []>} : vector<16x4xf32>, vector<4x128xf32>, vector<16x128xf32> -> vector<16x128xf32>
    %c0_43 = arith.constant 0 : index
    %c4_44 = arith.constant 4 : index
    %67 = vector.load %arg7[%c0_43, %c4_44] : memref<16x9xf32, #tpu.memory_space<vmem>>, vector<16x4xf32>
    %cst_45 = arith.constant dense<0.000000e+00> : vector<16x128xf32>
    %68 = tpu.matmul %67, %64, %cst_45 {dimension_numbers = #tpu.dot_dimension_numbers<[1], [0], [0], [1], [0, 0, 1, 1], [], []>} : vector<16x4xf32>, vector<4x128xf32>, vector<16x128xf32> -> vector<16x128xf32>
    %69 = arith.addf %66, %68 : vector<16x128xf32>
    %c0_46 = arith.constant 0 : index
    %c8 = arith.constant 8 : index
    %70 = vector.load %arg7[%c0_46, %c8] : memref<16x9xf32, #tpu.memory_space<vmem>>, vector<16x1xf32>
    %71 = vector.broadcast %70 : vector<16x1xf32> to vector<16x128xf32>
    %72 = arith.addf %69, %71 : vector<16x128xf32>
    %cst_47 = arith.constant 0.000000e+00 : f32
    %73 = vector.broadcast %cst_47 : f32 to vector<16x128xf32>
    %74 = arith.maximumf %72, %73 : vector<16x128xf32>
    %c0_48 = arith.constant 0 : index
    %c0_49 = arith.constant 0 : index
    %75 = vector.load %arg8[%c0_48, %c0_49] : memref<36x16xf32, #tpu.memory_space<vmem>>, vector<36x16xf32>
    %cst_50 = arith.constant dense<0.000000e+00> : vector<36x128xf32>
    %76 = tpu.matmul %75, %74, %cst_50 {dimension_numbers = #tpu.dot_dimension_numbers<[1], [0], [0], [1], [0, 0, 1, 1], [], []>} : vector<36x16xf32>, vector<16x128xf32>, vector<36x128xf32> -> vector<36x128xf32>
    %77 = vector.extract_strided_slice %76 {offsets = [0, 0], sizes = [4, 128], strides = [1, 1]} : vector<36x128xf32> to vector<4x128xf32>
    %78 = vector.extract_strided_slice %76 {offsets = [4, 0], sizes = [4, 128], strides = [1, 1]} : vector<36x128xf32> to vector<4x128xf32>
    %79 = vector.extract_strided_slice %76 {offsets = [16, 0], sizes = [4, 128], strides = [1, 1]} : vector<36x128xf32> to vector<4x128xf32>
    %c127_i32 = arith.constant 127 : i32
    %80 = tpu.dynamic_rotate %79 by %c127_i32 dim 1 : vector<4x128xf32>, i32 -> vector<4x128xf32>
    %81 = vector.broadcast %3 : vector<1x128xf32> to vector<4x128xf32>
    %82 = arith.mulf %80, %81 : vector<4x128xf32>
    %83 = arith.addf %78, %82 : vector<4x128xf32>
    %84 = vector.extract_strided_slice %76 {offsets = [8, 0], sizes = [4, 128], strides = [1, 1]} : vector<36x128xf32> to vector<4x128xf32>
    %85 = vector.extract_strided_slice %76 {offsets = [24, 0], sizes = [4, 128], strides = [1, 1]} : vector<36x128xf32> to vector<4x128xf32>
    %c120_i32 = arith.constant 120 : i32
    %86 = tpu.dynamic_rotate %85 by %c120_i32 dim 1 : vector<4x128xf32>, i32 -> vector<4x128xf32>
    %87 = vector.broadcast %4 : vector<1x128xf32> to vector<4x128xf32>
    %88 = arith.mulf %86, %87 : vector<4x128xf32>
    %89 = arith.addf %84, %88 : vector<4x128xf32>
    %90 = vector.extract_strided_slice %76 {offsets = [12, 0], sizes = [4, 128], strides = [1, 1]} : vector<36x128xf32> to vector<4x128xf32>
    %91 = vector.extract_strided_slice %76 {offsets = [20, 0], sizes = [4, 128], strides = [1, 1]} : vector<36x128xf32> to vector<4x128xf32>
    %c127_i32_51 = arith.constant 127 : i32
    %92 = tpu.dynamic_rotate %91 by %c127_i32_51 dim 1 : vector<4x128xf32>, i32 -> vector<4x128xf32>
    %93 = vector.broadcast %3 : vector<1x128xf32> to vector<4x128xf32>
    %94 = arith.mulf %92, %93 : vector<4x128xf32>
    %95 = arith.addf %90, %94 : vector<4x128xf32>
    %96 = vector.extract_strided_slice %76 {offsets = [28, 0], sizes = [4, 128], strides = [1, 1]} : vector<36x128xf32> to vector<4x128xf32>
    %c120_i32_52 = arith.constant 120 : i32
    %97 = tpu.dynamic_rotate %96 by %c120_i32_52 dim 1 : vector<4x128xf32>, i32 -> vector<4x128xf32>
    %98 = vector.broadcast %4 : vector<1x128xf32> to vector<4x128xf32>
    %99 = arith.mulf %97, %98 : vector<4x128xf32>
    %100 = arith.addf %95, %99 : vector<4x128xf32>
    %101 = vector.extract_strided_slice %76 {offsets = [32, 0], sizes = [4, 128], strides = [1, 1]} : vector<36x128xf32> to vector<4x128xf32>
    %c119_i32 = arith.constant 119 : i32
    %102 = tpu.dynamic_rotate %101 by %c119_i32 dim 1 : vector<4x128xf32>, i32 -> vector<4x128xf32>
    %103 = vector.broadcast %5 : vector<1x128xf32> to vector<4x128xf32>
    %104 = arith.mulf %102, %103 : vector<4x128xf32>
    %105 = arith.addf %100, %104 : vector<4x128xf32>
    %c0_53 = arith.constant 0 : index
    %c0_54 = arith.constant 0 : index
    %c0_55 = arith.constant 0 : index
    %c0_56 = arith.constant 0 : index
    %106 = vector.load %arg11[%c0_53, %c0_54, %c0_55, %c0_56] : memref<1x4x8x128xf32, #tpu.memory_space<vmem>>, vector<1x1x4x128xf32>
    %107 = vector.shape_cast %106 : vector<1x1x4x128xf32> to vector<4x128xf32>
    %108 = vector.shape_cast %77 : vector<4x128xf32> to vector<1x1x4x128xf32>
    tpu.vector_store %arg11[%c0_53, %c0_54, %c0_55, %c0_56], %108 {strides = array<i32>} : memref<1x4x8x128xf32, #tpu.memory_space<vmem>>, vector<1x1x4x128xf32>,
    %109 = vector.extract_strided_slice %7 {offsets = [0, 0], sizes = [4, 128], strides = [1, 1]} : vector<16x128xf32> to vector<4x128xf32>
    %c0_57 = arith.constant 0 : index
    %c0_58 = arith.constant 0 : index
    %c4_59 = arith.constant 4 : index
    %c0_60 = arith.constant 0 : index
    %110 = vector.load %arg11[%c0_57, %c0_58, %c4_59, %c0_60] : memref<1x4x8x128xf32, #tpu.memory_space<vmem>>, vector<1x1x4x128xf32>
    %111 = vector.shape_cast %110 : vector<1x1x4x128xf32> to vector<4x128xf32>
    %112 = vector.shape_cast %109 : vector<4x128xf32> to vector<1x1x4x128xf32>
    tpu.vector_store %arg11[%c0_57, %c0_58, %c4_59, %c0_60], %112 {strides = array<i32>} : memref<1x4x8x128xf32, #tpu.memory_space<vmem>>, vector<1x1x4x128xf32>,
    %c0_61 = arith.constant 0 : index
    %c1_62 = arith.constant 1 : index
    %c0_63 = arith.constant 0 : index
    %c0_64 = arith.constant 0 : index
    %113 = vector.load %arg11[%c0_61, %c1_62, %c0_63, %c0_64] : memref<1x4x8x128xf32, #tpu.memory_space<vmem>>, vector<1x1x4x128xf32>
    %114 = vector.shape_cast %113 : vector<1x1x4x128xf32> to vector<4x128xf32>
    %115 = vector.shape_cast %83 : vector<4x128xf32> to vector<1x1x4x128xf32>
    tpu.vector_store %arg11[%c0_61, %c1_62, %c0_63, %c0_64], %115 {strides = array<i32>} : memref<1x4x8x128xf32, #tpu.memory_space<vmem>>, vector<1x1x4x128xf32>,
    %116 = vector.extract_strided_slice %7 {offsets = [4, 0], sizes = [4, 128], strides = [1, 1]} : vector<16x128xf32> to vector<4x128xf32>
    %c0_65 = arith.constant 0 : index
    %c1_66 = arith.constant 1 : index
    %c4_67 = arith.constant 4 : index
    %c0_68 = arith.constant 0 : index
    %117 = vector.load %arg11[%c0_65, %c1_66, %c4_67, %c0_68] : memref<1x4x8x128xf32, #tpu.memory_space<vmem>>, vector<1x1x4x128xf32>
    %118 = vector.shape_cast %117 : vector<1x1x4x128xf32> to vector<4x128xf32>
    %119 = vector.shape_cast %116 : vector<4x128xf32> to vector<1x1x4x128xf32>
    tpu.vector_store %arg11[%c0_65, %c1_66, %c4_67, %c0_68], %119 {strides = array<i32>} : memref<1x4x8x128xf32, #tpu.memory_space<vmem>>, vector<1x1x4x128xf32>,
    %c0_69 = arith.constant 0 : index
    %c2_70 = arith.constant 2 : index
    %c0_71 = arith.constant 0 : index
    %c0_72 = arith.constant 0 : index
    %120 = vector.load %arg11[%c0_69, %c2_70, %c0_71, %c0_72] : memref<1x4x8x128xf32, #tpu.memory_space<vmem>>, vector<1x1x4x128xf32>
    %121 = vector.shape_cast %120 : vector<1x1x4x128xf32> to vector<4x128xf32>
    %122 = vector.shape_cast %89 : vector<4x128xf32> to vector<1x1x4x128xf32>
    tpu.vector_store %arg11[%c0_69, %c2_70, %c0_71, %c0_72], %122 {strides = array<i32>} : memref<1x4x8x128xf32, #tpu.memory_space<vmem>>, vector<1x1x4x128xf32>,
    %123 = vector.extract_strided_slice %7 {offsets = [8, 0], sizes = [4, 128], strides = [1, 1]} : vector<16x128xf32> to vector<4x128xf32>
    %c0_73 = arith.constant 0 : index
    %c2_74 = arith.constant 2 : index
    %c4_75 = arith.constant 4 : index
    %c0_76 = arith.constant 0 : index
    %124 = vector.load %arg11[%c0_73, %c2_74, %c4_75, %c0_76] : memref<1x4x8x128xf32, #tpu.memory_space<vmem>>, vector<1x1x4x128xf32>
    %125 = vector.shape_cast %124 : vector<1x1x4x128xf32> to vector<4x128xf32>
    %126 = vector.shape_cast %123 : vector<4x128xf32> to vector<1x1x4x128xf32>
    tpu.vector_store %arg11[%c0_73, %c2_74, %c4_75, %c0_76], %126 {strides = array<i32>} : memref<1x4x8x128xf32, #tpu.memory_space<vmem>>, vector<1x1x4x128xf32>,
    %c0_77 = arith.constant 0 : index
    %c3_78 = arith.constant 3 : index
    %c0_79 = arith.constant 0 : index
    %c0_80 = arith.constant 0 : index
    %127 = vector.load %arg11[%c0_77, %c3_78, %c0_79, %c0_80] : memref<1x4x8x128xf32, #tpu.memory_space<vmem>>, vector<1x1x4x128xf32>
    %128 = vector.shape_cast %127 : vector<1x1x4x128xf32> to vector<4x128xf32>
    %129 = vector.shape_cast %105 : vector<4x128xf32> to vector<1x1x4x128xf32>
    tpu.vector_store %arg11[%c0_77, %c3_78, %c0_79, %c0_80], %129 {strides = array<i32>} : memref<1x4x8x128xf32, #tpu.memory_space<vmem>>, vector<1x1x4x128xf32>,
    %130 = vector.extract_strided_slice %7 {offsets = [12, 0], sizes = [4, 128], strides = [1, 1]} : vector<16x128xf32> to vector<4x128xf32>
    %c0_81 = arith.constant 0 : index
    %c3_82 = arith.constant 3 : index
    %c4_83 = arith.constant 4 : index
    %c0_84 = arith.constant 0 : index
    %131 = vector.load %arg11[%c0_81, %c3_82, %c4_83, %c0_84] : memref<1x4x8x128xf32, #tpu.memory_space<vmem>>, vector<1x1x4x128xf32>
    %132 = vector.shape_cast %131 : vector<1x1x4x128xf32> to vector<4x128xf32>
    %133 = vector.shape_cast %130 : vector<4x128xf32> to vector<1x1x4x128xf32>
    tpu.vector_store %arg11[%c0_81, %c3_82, %c4_83, %c0_84], %133 {strides = array<i32>} : memref<1x4x8x128xf32, #tpu.memory_space<vmem>>, vector<1x1x4x128xf32>,
    return
  }
  func.func @transform_0(%arg0: i32) -> (i32, i32, i32) {
    %c0_i32 = arith.constant 0 : i32
    %c0_i32_0 = arith.constant 0 : i32
    %c0_i32_1 = arith.constant 0 : i32
    return %arg0, %c0_i32, %c0_i32_0 : i32, i32, i32
  }
  func.func @transform_1(%arg0: i32) -> (i32, i32, i32) {
    %c0_i32 = arith.constant 0 : i32
    %c0_i32_0 = arith.constant 0 : i32
    %c0_i32_1 = arith.constant 0 : i32
    return %arg0, %c0_i32, %c0_i32_0 : i32, i32, i32
  }
  func.func @transform_2(%arg0: i32) -> (i32, i32) {
    %c0_i32 = arith.constant 0 : i32
    %c0_i32_0 = arith.constant 0 : i32
    %c0_i32_1 = arith.constant 0 : i32
    return %c0_i32, %c0_i32_0 : i32, i32
  }
  func.func @transform_3(%arg0: i32) -> (i32, i32) {
    %c0_i32 = arith.constant 0 : i32
    %c0_i32_0 = arith.constant 0 : i32
    %c0_i32_1 = arith.constant 0 : i32
    return %c0_i32, %c0_i32_0 : i32, i32
  }
  func.func @transform_4(%arg0: i32) -> (i32, i32) {
    %c0_i32 = arith.constant 0 : i32
    %c0_i32_0 = arith.constant 0 : i32
    %c0_i32_1 = arith.constant 0 : i32
    return %c0_i32, %c0_i32_0 : i32, i32
  }
  func.func @transform_5(%arg0: i32) -> (i32, i32) {
    %c0_i32 = arith.constant 0 : i32
    %c0_i32_0 = arith.constant 0 : i32
    %c0_i32_1 = arith.constant 0 : i32
    return %c0_i32, %c0_i32_0 : i32, i32
  }
  func.func @transform_6(%arg0: i32) -> (i32, i32) {
    %c0_i32 = arith.constant 0 : i32
    %c0_i32_0 = arith.constant 0 : i32
    %c0_i32_1 = arith.constant 0 : i32
    return %c0_i32, %c0_i32_0 : i32, i32
  }
  func.func @transform_7(%arg0: i32) -> (i32, i32) {
    %c0_i32 = arith.constant 0 : i32
    %c0_i32_0 = arith.constant 0 : i32
    %c0_i32_1 = arith.constant 0 : i32
    return %c0_i32, %c0_i32_0 : i32, i32
  }
  func.func @transform_8(%arg0: i32) -> (i32, i32) {
    %c0_i32 = arith.constant 0 : i32
    %c0_i32_0 = arith.constant 0 : i32
    %c0_i32_1 = arith.constant 0 : i32
    return %c0_i32, %c0_i32_0 : i32, i32
  }
  func.func @transform_9(%arg0: i32) -> (i32, i32, i32) {
    %c0_i32 = arith.constant 0 : i32
    %c0_i32_0 = arith.constant 0 : i32
    %c0_i32_1 = arith.constant 0 : i32
    return %arg0, %c0_i32, %c0_i32_0 : i32, i32, i32
  }
  func.func @transform_10(%arg0: i32) -> (i32, i32, i32, i32) {
    %c0_i32 = arith.constant 0 : i32
    %c0_i32_0 = arith.constant 0 : i32
    %c0_i32_1 = arith.constant 0 : i32
    %c0_i32_2 = arith.constant 0 : i32
    return %arg0, %c0_i32, %c0_i32_0, %c0_i32_1 : i32, i32, i32, i32
  }
}

</mosaic_0001>

<bundles_post_ra>
// kernel: tpu_custom_call.1
= control target key start
LH: loop header
LB: loop body
LE: loop exit
PB: predicated region body
PF: predicated region fallthrough
CT: control target
= control target key end

     0   :  { %s1458_s0 = inlined_call_operand.vmem [shape: f32[2,16,128], index: 0, kind: input, shape index: {}]   ;;  %s1459_s1 = inlined_call_operand.vmem [shape: f32[2,4,128], index: 1, kind: input, shape index: {}]   ;;  %s1460_s2 = inlined_call_operand.vmem [shape: f32[16,2], index: 2, kind: input, shape index: {}]   ;;  %s1461_s3 = inlined_call_operand.vmem [shape: f32[64,17], index: 3, kind: input, shape index: {}]   ;;  %s1462_s4 = inlined_call_operand.vmem [shape: f32[16,64], index: 4, kind: input, shape index: {}]   ;;  %s1463_s5 = inlined_call_operand.vmem [shape: f32[8,2], index: 5, kind: input, shape index: {}]   ;;  %s1464_s6 = inlined_call_operand.vmem [shape: f32[16,9], index: 6, kind: input, shape index: {}]   ;;  %s1465_s7 = inlined_call_operand.vmem [shape: f32[36,16], index: 7, kind: input, shape index: {}]   ;;  %s1466_s8 = inlined_call_operand.vmem [shape: f32[6,128], index: 8, kind: input, shape index: {}]   ;;  %s1467_s9 = inlined_call_operand.hbm [shape: f32[2,8,128], index: 9, kind: output, shape index: {0}]   ;;  %s1468_s10 = inlined_call_operand.hbm [shape: f32[2,4,8,128], index: 10, kind: output, shape index: {1}]  }
   0x1   :  { %1470 = sst [smem:[#allocation8_spill]] %s1458_s0 }
   0x2   :  { %1471 = sst [smem:[#allocation9_spill]] %s1459_s1 }
   0x3   :  { %1472 = sst [smem:[#allocation10_spill]] %s1460_s2 }
   0x4   :  { %1473 = sst [smem:[#allocation11_spill]] %s1461_s3 }
   0x5   :  { %1474 = sst [smem:[#allocation12_spill]] %s1462_s4 }
   0x6   :  { %1475 = sst [smem:[#allocation13_spill]] %s1463_s5 }
   0x7   :  { %1476 = sst [smem:[#allocation14_spill]] %s1464_s6 }
   0x8   :  { %16 = vsyncpa [#allocation3], 0 }
   0x9   :  { %18 = vsyncpa [#allocation3 + $0x1], 0 }
   0xa   :  { %19 = vsyncpa [#allocation5], 0 }
   0xb   :  { %21 = vsyncpa [#allocation5 + $0x1], 0  ;;  %s1227_s13 = smov 0   ;;  %s1229_s14 = smov 0  }
   0xc   :  { %s1231_s15 = smov 0   ;;  %s1233_s16 = smov 0  }
   0xd LB: > { %s1248_s17 = sadd.s32 4294967295, %s1158_s16   ;;  %s944_s18 = sadd.s32 4294967294, %s1158_s16   ;;  %s1158_s16 = sphi %s1233_s16, %s1490_s16   ;;  %s1154_s15 = sphi %s1231_s15, %s1489_s15   ;;  %s1150_s14 = sphi %s1229_s14, %s1488_s14   ;;  %s1146_s13 = sphi %s1227_s13, %s1487_s13  }
   0xe   : > { %s1252_s19 = sadd.s32 1, %s1158_s16   ;;  %s233_s20 = sadd.s32 1, %s1154_s15 }
   0xf   : > { %s230_s21 = ssub.s32 %s1158_s16, %s1252_s19  ;;  %p243_p0 = scmp.ne.s32.totalorder %s1154_s15, %s1150_s14 }
  0x10   : > { %p231_p1 = scmp.eq.s32.totalorder %s230_s21, 0  ;;  %p244_p2 = scmp.eq.s32.totalorder %s1248_s17, 1 }
  0x11   : > { %p249_p3 = scmp.ne.s32.totalorder %s1150_s14, %s1146_s13  ;;  %p250_p4 = scmp.eq.s32.totalorder %s944_s18, 1 }
  0x12   : > { %s1263_s22 = scalar_select %p231_p1, %s1154_s15, %s233_s20  }
  0x13   : > { %p1265_p5 = por %p244_p2, %p243_p0  ;;  %p1269_p6 = por %p250_p4, %p249_p3 }
  0x14   : > { %p947_p7 = scmp.ge.s32.totalorder %s1158_s16, 1  ;;  %p330_p8 = scmp.lt.s32.totalorder %s1158_s16, 3 }
  0x16   : > { %p331_p9 = pnand %p947_p7, %p330_p8 }
  0x17   : > { %s1479_s2 = sld [smem:[#allocation10_spill]] (!%p331_p9)  ;;  %p377_p10 = scmp.lt.s32.totalorder (!%p331_p9), %s1248_s17, 1 }
  0x18   : > { %334 = sbr.rel (%p331_p9) target bundleno = 1026 (0x402), region = 56  ;;  %s1288_s11 = sand.u32 (!%p331_p9), 1, %s1150_s14  }
  0x19   : > { %s949_s12 = sshll.u32 (!%p331_p9), %s1288_s11, 5  ;;  %s1480_s0 = sld [smem:[#allocation8_spill]] (!%p331_p9) }
  0x1a   : > { %s1294_s25 = scalar_lea.vmem (!%p331_p9), [#allocation4], %s949_s12  ;;  %s1481_s3 = sld [smem:[#allocation11_spill]] (!%p331_p9) }
  0x1b   : > { %s1482_s4 = sld [smem:[#allocation12_spill]] (!%p331_p9)  ;;  %s1163_s12 = smov (!%p331_p9), 1  }
  0x1c   : > { %s1483_s5 = sld [smem:[#allocation13_spill]] (!%p331_p9)  ;;  %s1165_s26 = smov (!%p331_p9), 9  }
  0x1d   : > { %v395_v0 = vld [vmem:[%s1479_s2 + $0x8] sm:$0xff]  ;;  %v1160_v1 = vmov 1   ;;  %v1161_v2 = vmov 0   ;;  %v394_v3 = vld [vmem:[%s1479_s2] sm:$0xff]  ;;  %s1284_s29 = scalar_select %p377_p10, %s1248_s17, 1  ;;  %v1162_v7 = vmov 16  }
  0x1e   : > { %1048 = vset.pattern.permute.xlu1 %v1160_v1  ;;  %1047 = vset.pattern.permute.xlu0 %v1161_v2  ;;  %vm468_vm0 = vcmask 130048   ;;  %vm536_vm1 = vcmask 523264   ;;  %s1484_s6 = sld [smem:[#allocation14_spill]]  ;;  %vm629_vm2 = vcmask 1043456   ;;  %vm624_vm3 = vcmask 31744   ;;  %s1168_s18 = smov 127  }
  0x1f   : > { %413 = vperm.xlu1 %1048, %v395_v0   ;;  %403 = vperm.xlu0 %1047, %v395_v0   ;;  %s987_s30 = sshll.u32 %s1284_s29, 4  ;;  %s1485_s1 = sld [smem:[#allocation9_spill]] }
  0x20   : > { %s381_s21 = scalar_lea.vmem %s1480_s0, %s987_s30  ;;  %v425_v6 = vld [vmem:[%s1481_s3 + $0x28] sm:$0xff]  ;;  %1049 = vset.pattern.permute.xlu2 %v1162_v7  ;;  %v420_v8 = vld [vmem:[%s1481_s3] sm:$0xff]  ;;  %v427_v9 = vld [vmem:[%s1481_s3 + $0x38] sm:$0xff]  ;;  %s948_s0 = sshll.u32 %s1288_s11, 3 }
  0x21   : > { %v393_v4 = vld [vmem:[%s381_s21 + $0x8] sm:$0xff]  ;;  %v392_v5 = vld [vmem:[%s381_s21] sm:$0xff]  ;;  %465 = vperm.xlu2 %1049, %v427_v9   ;;  %v426_v16 = vld [vmem:[%s1481_s3 + $0x30] sm:$0xff]  ;;  %s1469_s21 = smov 8  }
  0x22   : > { %977 = vst [vmem:[%s1294_s25 + $0x14] sm:$0xf] %v393_v4  ;;  %v424_v12 = vld [vmem:[%s1481_s3 + $0x20] sm:$0xff]  ;;  %v422_v18 = vld [vmem:[%s1481_s3 + $0x10] sm:$0xff]  ;;  %v423_v23 = vld [vmem:[%s1481_s3 + $0x18] sm:$0xff] }
  0x23   : > { %979 = vst [vmem:[%s1294_s25 + $0x18] sm:$0xf0] %v393_v4  ;;  %v421_v24 = vld [vmem:[%s1481_s3 + $0x8] sm:$0xff]  ;;  %v534_v57 = vld [vmem:[%s1482_s4] sm:$0xff]  ;;  %s1358_s3 = scalar_lea.vmem [#allocation2], %s948_s0 }
  0x24   : > { %792 = vst [vmem:[%s1294_s25 + $0x4] sm:$0xf] %v392_v5  ;;  %v535_v58 = vld [vmem:[%s1482_s4 + $0x8] sm:$0xff]  ;;  %v590_v62 = vld [vmem:[%s1483_s5] sm:$0xf]  ;;  %s820_s28 = sshll.u32 %s1358_s3, 4  ;;  %s821_s28 = int_to_ptr.vmem [resolvable:$true] %s820_s28 }
  0x25   : > { %975 = vst [vmem:[%s1294_s25 + $0x8] sm:$0xf0] %v392_v5  ;;  %v603_v0 = vld [vmem:[%s1483_s5 + $0x4] sm:$0xf]  ;;  %s1084_s4 = scalar_lea.hbm %s1467_s9, 16 }
  0x27   : > { %409 = vperm.xlu1 %1048, %v394_v3   ;;  %398 = vperm.xlu0 %1047, %v394_v3   ;;  %v617_v3 = vld [vmem:[%s1484_s6 + $0x8] sm:$0xff] }
  0x29   : > { %460 = vperm.xlu2 %1049, %v426_v16  }
  0x2f   : > { %1050 = vset.pattern.permute.xlu0 %v1162_v7  ;;  %1051 = vset.pattern.permute.xlu1 %v1162_v7  ;;  %v1167_v7 = vmov 8  }
  0x30   : > { %455 = vperm.xlu0 %1050, %v425_v6   ;;  %450 = vperm.xlu1 %1051, %v424_v12  }
  0x31   : > { %445 = vperm.xlu2 %1049, %v423_v23  }
  0x38   : > { %430 = vperm.xlu0 %1050, %v420_v8   ;;  %440 = vperm.xlu1 %1051, %v422_v18  }
  0x39   : > { %435 = vperm.xlu2 %1049, %v421_v24  }
  0x40   : > { %1054 = vset.pattern.permute.xlu0 %v1161_v2  ;;  %1052 = vset.pattern.permute.xlu1 %v1161_v2  ;;  %v616_v2 = vld [vmem:[%s1484_s6] sm:$0xff] }
  0x41   : > { %1053 = vset.pattern.permute.xlu2 %v1160_v1 }
  0x7b   : > { %v466_v26 = vpop.permute.xlu2 %465 }
  0x83   : > { %v461_v29 = vpop.permute.xlu2 %460 }
  0x8b   : > { %v446_v37 = vpop.permute.xlu2 %445 }
  0x91   : > { %v414_v10 = vpop.permute.xlu1 %413  ;;  %v404_v11 = vpop.permute.xlu0 %403 }
  0x92   : > { %v407_v13 = vmul.f32 %v404_v11, %v393_v4  ;;  %v1060_v11 = vld [vmem:[%s1466_s8 + $0x2] ss:$0 sm:$0xff] }
  0x93   : > { %v436_v47 = vpop.permute.xlu2 %435 }
  0x94   : > { %v417_v14 = vadd.f32 %v414_v10, %v407_v13 }
  0x96   : > { %v419_v15 = vmax.f32 %v417_v14, 0.0 }
  0x98   : > { %499 = vmatpush.msra.mxu0 %v419_v15  ;;  %989 = vmatpush.msra.mxu3 %v419_v15 }
  0x99   : > { %v399_v17 = vpop.permute.xlu0 %398  ;;  %v410_v20 = vpop.permute.xlu1 %409 }
  0x9a   : > { %v406_v19 = vmul.f32 %v399_v17, %v392_v5 }
  0x9c   : > { %v416_v21 = vadd.f32 %v410_v20, %v406_v19 }
  0x9e   : > { %v418_v22 = vmax.f32 %v416_v21, 0.0 }
  0xa0   : > { %500 = vmatpush.msra.mxu0 %v418_v22  ;;  %990 = vmatpush.msra.mxu3 %v418_v22 }
  0xa1   : > { %953 = vmatmul.msk.f32.vlgmr.msra.gmra.mxu0 %vm468_vm0, %v420_v8  ;;  %958 = vmatmul.msk.f32.vlgmr.msra.gmra.mxu3 %vm468_vm0, %v425_v6  ;;  %v1058_v8 = vld [vmem:[%s1466_s8 + $0x1] ss:$0 sm:$0xff] }
  0xa2   : > { %v451_v32 = vpop.permute.xlu1 %450  ;;  %v456_v34 = vpop.permute.xlu0 %455 }
  0xa9   : > { %954 = vmatmul.msk.f32.gmra.mxu0 %vm468_vm0, %v421_v24  ;;  %959 = vmatmul.msk.f32.gmra.mxu3 %vm468_vm0, %v426_v16 }
  0xaa   : > { %v441_v43 = vpop.permute.xlu1 %440  ;;  %v431_v50 = vpop.permute.xlu0 %430 }
  0xb1   : > { %955 = vmatmul.msk.f32.gmra.mxu0 %vm468_vm0, %v422_v18  ;;  %960 = vmatmul.msk.f32.gmra.mxu3 %vm468_vm0, %v427_v9 }
  0xb9   : > { %956 = vmatmul.msk.f32.gmra.mxu0 %vm468_vm0, %v423_v23 }
  0xc1   : > { %957 = vmatmul.msk.f32.gmra.mxu0 %vm468_vm0, %v424_v12 }
 0x11e   : > { %v502_v25 = vpop.f32.mrf.mxu0 }
 0x11f   : > { %v503_v53 = vadd.f32 %v502_v25, %v431_v50 }
 0x121   : > { %v526_v56 = vmax.f32 %v503_v53, 0.0 }
 0x124   : > { %v517_v27 = vpop.f32.mrf.mxu3 }
 0x125   : > { %v518_v39 = vadd.f32 %v517_v27, %v456_v34 }
 0x126   : > { %v505_v28 = vpop.f32.mrf.mxu0 }
 0x127   : > { %v531_v42 = vmax.f32 %v518_v39, 0.0  ;;  %v506_v51 = vadd.f32 %v505_v28, %v436_v47 }
 0x129   : > { %v527_v55 = vmax.f32 %v506_v51, 0.0 }
 0x12c   : > { %v520_v30 = vpop.f32.mrf.mxu3 }
 0x12d   : > { %v521_v35 = vadd.f32 %v520_v30, %v461_v29 }
 0x12e   : > { %v508_v31 = vpop.f32.mrf.mxu0 }
 0x12f   : > { %v532_v41 = vmax.f32 %v521_v35, 0.0  ;;  %v509_v48 = vadd.f32 %v508_v31, %v441_v43  ;;  %v700_v43 = vld [vmem:[%s1465_s7 + $0x10] sm:$0xff] }
 0x131   : > { %v528_v54 = vmax.f32 %v509_v48, 0.0 }
 0x134   : > { %v523_v33 = vpop.f32.mrf.mxu3 }
 0x135   : > { %v524_v36 = vadd.f32 %v523_v33, %v466_v26 }
 0x136   : > { %v511_v38 = vpop.f32.mrf.mxu0 }
 0x137   : > { %v533_v40 = vmax.f32 %v524_v36, 0.0  ;;  %v512_v45 = vadd.f32 %v511_v38, %v446_v37 }
 0x139   : > { %551 = vmatpush.msra.mxu1 %v533_v40  ;;  %v529_v52 = vmax.f32 %v512_v45, 0.0  ;;  %v702_v45 = vld [vmem:[%s1465_s7 + $0x20] sm:$0xf] }
 0x13b   : > { %552 = vmatpush.msra.mxu1 %v532_v41  ;;  %v698_v41 = vld [vmem:[%s1465_s7] sm:$0xff] }
 0x13d   : > { %553 = vmatpush.msra.mxu1 %v531_v42  ;;  %v699_v42 = vld [vmem:[%s1465_s7 + $0x8] sm:$0xff] }
 0x13e   : > { %v514_v44 = vpop.f32.mrf.mxu0 }
 0x13f   : > { %v515_v46 = vadd.f32 %v514_v44, %v451_v32  ;;  %v701_v44 = vld [vmem:[%s1465_s7 + $0x18] sm:$0xff] }
 0x141   : > { %v530_v49 = vmax.f32 %v515_v46, 0.0 }
 0x143   : > { %554 = vmatpush.msra.mxu1 %v530_v49 }
 0x145   : > { %555 = vmatpush.msra.mxu1 %v529_v52 }
 0x147   : > { %556 = vmatpush.msra.mxu1 %v528_v54 }
 0x149   : > { %557 = vmatpush.msra.mxu1 %v527_v55 }
 0x14b   : > { %558 = vmatpush.msra.mxu1 %v526_v56 }
 0x14c   : > { %961 = vmatmul.msk.f32.vlgmr.msra.gmra.mxu1 %vm536_vm1, %v534_v57 }
 0x154   : > { %962 = vmatmul.msk.f32.gmra.mxu1 %vm536_vm1, %v535_v58 }
 0x1c9   : > { %v560_v59 = vpop.f32.mrf.mxu1 }
 0x1ca   : > { %v567_v60 = vrot.slane %v560_v59, 4 }
 0x1cc   : > { %569 = vrot.lane.b32.xlu1 %v567_v60, %s1163_s12  ;;  %s803_s12 = scalar_lea.sflag [#allocation3], %s1288_s11 }
 0x1d1   : > { %v563_v61 = vpop.f32.mrf.mxu1 }
 0x1d2   : > { %v580_v63 = vrot.slane %v563_v61, 4  ;;  %574 = vrot.lane.b32.xlu2 %v563_v61, %s1469_s21  ;;  %s1166_s21 = smov 124  }
 0x1d4   : > { %582 = vrot.lane.b32.xlu0 %v580_v63, %s1165_s26  ;;  %593 = vperm.xlu1 %1052, %v590_v62   ;;  %s952_s26 = sshll.u32 %s1284_s29, 2 }
 0x1d5   : > { %s385_s2 = scalar_lea.vmem %s1485_s1, %s952_s26 }
 0x1d6   : > { %v587_v4 = vld [vmem:[%s385_s2] sm:$0xf]  ;;  %s982_s2 = sshll.u32 %s1248_s17, 3 }
 0x1d7   : > { %589 = vst [vmem:[%s1358_s3 + $0x4] sm:$0xf] %v587_v4  ;;  %s818_s27 = scalar_lea.hbm %s1467_s9, %s982_s2 }
 0x1d8   : > { %s822_s30 = sshll.u32 %s818_s27, 4  ;;  %s823_s30 = int_to_ptr.hbm [resolvable:$true] %s822_s30 }
 0x1d9   : > { %s1078_s29 = sshra.s32 %s823_s30, 4  ;;  %s1079_s29 = int_to_ptr.hbm [resolvable:$true] %s1078_s29 }
 0x1da   : > { %598 = vperm.xlu2 %1053, %v590_v62   ;;  %p1085_p0 = scmp.lt.s32.totalorder %s1079_s29, %s1467_s9 }
 0x1dc   : > { %606 = vperm.xlu0 %1054, %v603_v0   ;;  %1055 = vset.pattern.permute.xlu1 %v1160_v1  ;;  %v1059_v1 = vld [vmem:[%s1466_s8] ss:$0 sm:$0xff] }
 0x1dd   : > { %611 = vperm.xlu1 %1055, %v603_v0  }
 0x1e2   : > { %620 = vrot.lane.b32.xlu2 %v616_v2, %s1166_s21 }
 0x1e3   : > { %1056 = vset.pattern.permute.xlu2 %v1167_v7 }
 0x1e4   : > { %1057 = vset.pattern.permute.xlu0 %v1167_v7 }
 0x1e5   : > { %622 = vrot.lane.b32.xlu1 %v617_v3, %s1166_s21  ;;  %687 = vperm.xlu0 %1057, %v616_v2   ;;  %s1080_s21 = scalar_lea.hbm %s1079_s29, 8 }
 0x1e6   : > { %p1081_p11 = scmp.ne.s32.totalorder %s1079_s29, %s1080_s21  ;;  %p1086_p1 = scmp.lt.s32.totalorder %s1084_s4, %s1080_s21 }
 0x1e8   : > { %p1082_p12 = pnand %p1081_p11, %p1265_p5  ;;  %p1087_p2 = por %p1086_p1, %p1085_p0 }
 0x1ea   : > { %691 = vperm.xlu2 %1056, %v617_v3   ;;  %p1083_p13 = pneg %p1082_p12 }
 0x1ec   : > { %p1088_p3 = pnand %p1087_p2, %p1083_p13 }
 0x22c   : > { %v575_v9 = vpop.permute.xlu2 %574 }
 0x22d   : > { %v577_v12 = vmul.f32 %v1058_v8, %v575_v9 }
 0x234   : > { %v599_v18 = vpop.permute.xlu2 %598 }
 0x23c   : > { %v621_v27 = vpop.permute.xlu2 %620 }
 0x23e   : > { %v570_v5 = vpop.permute.xlu1 %569 }
 0x23f   : > { %v572_v6 = vmul.f32 %v1059_v1, %v570_v5 }
 0x241   : > { %v573_v10 = vadd.f32 %v572_v6, %v560_v59 }
 0x243   : > { %v578_v16 = vadd.f32 %v577_v12, %v573_v10 }
 0x244   : > { %v692_v35 = vpop.permute.xlu2 %691 }
 0x246   : > { %v583_v13 = vpop.permute.xlu0 %582  ;;  %v594_v14 = vpop.permute.xlu1 %593 }
 0x247   : > { %v585_v15 = vmul.f32 %v1060_v11, %v583_v13 }
 0x249   : > { %v586_v17 = vadd.f32 %v585_v15, %v578_v16 }
 0x24b   : > { %588 = vst [vmem:[%s1358_s3] sm:$0xf] %v586_v17  ;;  %v596_v19 = vmul.f32 %v594_v14, %v586_v17 }
 0x24d   : > { %v601_v20 = vadd.f32 %v599_v18, %v596_v19 }
 0x24e   : > { %v607_v21 = vpop.permute.xlu0 %606 }
 0x24f   : > { %v602_v22 = vmax.f32 %v601_v20, 0.0  ;;  %v609_v23 = vmul.f32 %v607_v21, %v587_v4  ;;  %v612_v24 = vpop.permute.xlu1 %611 }
 0x251   : > { %966 = vmatpush.msk.msrb.mxu3 %vm629_vm2, %v602_v22  ;;  %v614_v25 = vadd.f32 %v612_v24, %v609_v23 }
 0x252   : > { %967 = vmatmul.msk.f32.vlgmr.msrb.gmra.mxu3 %vm624_vm3, %v616_v2 }
 0x253   : > { %v615_v26 = vmax.f32 %v614_v25, 0.0 }
 0x255   : > { %963 = vmatpush.msk.msrb.mxu1 %vm629_vm2, %v615_v26 }
 0x256   : > { %964 = vmatmul.msk.f32.vlgmr.msrb.gmra.mxu1 %vm624_vm3, %v621_v27 }
 0x257   : > { %v623_v28 = vpop.permute.xlu1 %622  ;;  %v688_v33 = vpop.permute.xlu0 %687 }
 0x25a   : > { %968 = vmatmul.msk.f32.gmra.mxu3 %vm624_vm3, %v617_v3 }
 0x25e   : > { %965 = vmatmul.msk.f32.gmra.mxu1 %vm624_vm3, %v623_v28 }
 0x2d3   : > { %v650_v29 = vpop.f32.mrf.mxu1 }
 0x2d5   : > { %v680_v30 = vpop.f32.mrf.mxu3 }
 0x2d6   : > { %v681_v32 = vadd.f32 %v680_v30, %v650_v29 }
 0x2d8   : > { %v694_v37 = vadd.f32 %v688_v33, %v681_v32 }
 0x2da   : > { %v696_v40 = vmax.f32 %v694_v37, 0.0 }
 0x2db   : > { %v653_v31 = vpop.f32.mrf.mxu1 }
 0x2dd   : > { %v683_v34 = vpop.f32.mrf.mxu3 }
 0x2de   : > { %v684_v36 = vadd.f32 %v683_v34, %v653_v31 }
 0x2e0   : > { %v695_v38 = vadd.f32 %v692_v35, %v684_v36 }
 0x2e2   : > { %v697_v39 = vmax.f32 %v695_v38, 0.0 }
 0x2e4   : > { %732 = vmatpush.msra.mxu2 %v697_v39 }
 0x2e6   : > { %733 = vmatpush.msra.mxu2 %v696_v40 }
 0x2e7   : > { %969 = vmatmul.msk.f32.vlgmr.msra.gmra.mxu2 %vm468_vm0, %v698_v41 }
 0x2ef   : > { %970 = vmatmul.msk.f32.gmra.mxu2 %vm468_vm0, %v699_v42 }
 0x2f7   : > { %971 = vmatmul.msk.f32.gmra.mxu2 %vm468_vm0, %v700_v43 }
 0x2ff   : > { %972 = vmatmul.msk.f32.gmra.mxu2 %vm468_vm0, %v701_v44 }
 0x307   : > { %973 = vmatmul.msk.f32.gmra.mxu2 %vm468_vm0, %v702_v45 }
 0x36a   : > { %v1391_v46 = vpop.f32.mrf.mxu2 }
 0x36b   : > { %791 = vst [vmem:[%s1294_s25] sm:$0xf] %v1391_v46 }
 0x372   : > { %v738_v47 = vpop.f32.mrf.mxu2 }
 0x37a   : > { %v741_v48 = vpop.f32.mrf.mxu2 }
 0x37b   : > { %v764_v49 = vrot.slane %v741_v48, 4 }
 0x37d   : > { %766 = vrot.lane.b32.xlu1 %v764_v49, %s1168_s18 }
 0x37e   : > { %1091 = shalt.err (!%p1088_p3)
}
 0x37f   : > { %991 = dma.vmem_to_hbm [thread:$0]  (%p1265_p5), %s821_s28, 128, %s823_s30, %s803_s12   ;;  %v1061_v54 = vld [vmem:[%s1466_s8 + $0x4] ss:$0 sm:$0xff]  ;;  %v1062_v55 = vld [vmem:[%s1466_s8 + $0x3] ss:$0 sm:$0xff] }
 0x380   : > { %s1169_s3 = smov 120   ;;  %s1170_s1 = smov 119   ;;  %v1063_v56 = vld [vmem:[%s1466_s8 + $0x5] ss:$0 sm:$0xff] }
 0x381   : > { %s834_s12 = sshll.u32 %s1294_s25, 4  ;;  %s808_s29 = scalar_lea.sflag [#allocation5], %s1288_s11  ;;  %s835_s12 = int_to_ptr.vmem [resolvable:$true] %s834_s12 }
 0x382   : > { %v744_v50 = vpop.f32.mrf.mxu2  ;;  %s1112_s5 = scalar_lea.hbm %s1468_s10, 64 }
 0x383   : > { %v774_v51 = vrot.slane %v744_v50, 4  ;;  %758 = vrot.lane.b32.xlu0 %v744_v50, %s1169_s3 }
 0x385   : > { %750 = vrot.lane.b32.xlu1 %v741_v48, %s1168_s18  ;;  %776 = vrot.lane.b32.xlu2 %v774_v51, %s1169_s3  ;;  %s988_s18 = sshll.u32 %s1248_s17, 5 }
 0x386   : > { %s833_s30 = scalar_lea.hbm %s1468_s10, %s988_s18 }
 0x387   : > { %s836_s17 = sshll.u32 %s833_s30, 4  ;;  %s837_s17 = int_to_ptr.hbm [resolvable:$true] %s836_s17 }
 0x388   : > { %s1106_s21 = sshra.s32 %s837_s17, 4  ;;  %s1107_s21 = int_to_ptr.hbm [resolvable:$true] %s1106_s21 }
 0x389   : > { %s1108_s0 = scalar_lea.hbm %s1107_s21, 32  ;;  %p1113_p9 = scmp.lt.s32.totalorder %s1107_s21, %s1468_s10 }
 0x38a   : > { %v747_v52 = vpop.f32.mrf.mxu2  ;;  %p1109_p4 = scmp.ne.s32.totalorder %s1107_s21, %s1108_s0  ;;  %p1114_p10 = scmp.lt.s32.totalorder %s1112_s5, %s1108_s0 }
 0x38c   : > { %p1110_p7 = pnand %p1109_p4, %p1265_p5  ;;  %p1115_p11 = por %p1114_p10, %p1113_p9 }
 0x38d   : > { %783 = vrot.lane.b32.xlu2 %v747_v52, %s1170_s1 }
 0x38e   : > { %p1111_p8 = pneg %p1110_p7 }
 0x390   : > { %p1116_p12 = pnand %p1115_p11, %p1111_p8 }
 0x3df   : > { %v777_v53 = vpop.permute.xlu2 %776 }
 0x3e0   : > { %v778_v59 = vmul.f32 %v1061_v54, %v777_v53 }
 0x3e2   : > { %v780_v63 = vrot.slane %v778_v59, 4 }
 0x3e7   : > { %v784_v57 = vpop.permute.xlu2 %783 }
 0x3e8   : > { %v786_v61 = vmul.f32 %v1063_v56, %v784_v57 }
 0x3ea   : > { %v788_v2 = vrot.slane %v786_v61, 4 }
 0x3ef   : > { %v767_v58 = vpop.permute.xlu1 %766 }
 0x3f0   : > { %v768_v60 = vmul.f32 %v1062_v55, %v767_v58 }
 0x3f2   : > { %v770_v62 = vrot.slane %v768_v60, 4 }
 0x3f4   : > { %v772_v0 = vadd.f32 %v770_v62, %v738_v47 }
 0x3f5   : > { %v759_v3 = vpop.permute.xlu0 %758 }
 0x3f6   : > { %v782_v4 = vadd.f32 %v780_v63, %v772_v0  ;;  %v761_v1 = vmul.f32 %v1061_v54, %v759_v3 }
 0x3f7   : > { %v751_v5 = vpop.permute.xlu1 %750 }
 0x3f8   : > { %v790_v6 = vadd.f32 %v788_v2, %v782_v4  ;;  %v762_v7 = vadd.f32 %v761_v1, %v738_v47  ;;  %v753_v8 = vmul.f32 %v1062_v55, %v751_v5 }
 0x3fa   : > { %978 = vst [vmem:[%s1294_s25 + $0x14] sm:$0xf0] %v790_v6  ;;  %v755_v9 = vrot.slane %v753_v8, 4 }
 0x3fb   : > { %976 = vst [vmem:[%s1294_s25 + $0x10] sm:$0xf] %v762_v7 }
 0x3fc   : > { %v757_v10 = vadd.f32 %v755_v9, %v1391_v46 }
 0x3fe   : > { %974 = vst [vmem:[%s1294_s25 + $0x4] sm:$0xf0] %v757_v10 }
 0x3ff   : > { %1119 = shalt.err (!%p1116_p12)
}
 0x400   : > { %s1171_s11 = smov 128   ;;  %s1486_s25 = smov 8  }
 0x401   : > { %992 = dma.vmem_to_hbm [thread:$0]  (%p1265_p5), %s835_s12, 512, %s837_s17, %s808_s29, %s1171_s11, %s1171_s11, %s1486_s25  }
 0x402 PF: > { %p1002_p13 = scmp.ge.s32.totalorder %s1158_s16, 2  ;;  %s851_s2 = sand.u32 1, %s1146_s13  }
 0x403   : > { %s852_s20 = scalar_lea.sflag [#allocation3], %s851_s2 }
 0x404   : > { %p996_p0 = pnand %p1002_p13, %p1269_p6 }
 0x406   : > { %p997_p1 = pneg %p996_p0 }
 0x408   : > { %1137 = dma.done.wait (%p997_p1), %s852_s20, 128  }
 0x409   : > { %1139 = vsyncadd (%p997_p1), %s852_s20, 4294967168  ;;  %s862_s26 = scalar_lea.sflag [#allocation5], %s851_s2 }
 0x40a   : > { %1141 = dma.done.wait (%p997_p1), %s862_s26, 512  }
 0x40b   : > { %1143 = vsyncadd (%p997_p1), %s862_s26, 4294966784  ;;  %p24_p5 = scmp.ge.s32.totalorder %s1252_s19, 4   ;;  %s1487_s13 = smov %s1150_s14 }
 0x40c   : > { %s1488_s14 = smov %s1154_s15  ;;  %s1489_s15 = smov %s1263_s22 }
 0x40d   : > { %s1490_s16 = smov %s1252_s19  ;;  %26 = sbr.rel (!%p24_p5) target bundleno = 13 (0xd), region = 114 }
 0x412   :  { %868 = vsyncpa [#allocation3], 1 }
 0x413   :  { %870 = vsyncpa [#allocation3 + $0x1], 1 }
 0x414   :  { %871 = vsyncpa [#allocation5], 1 }
 0x415   :  { %873 = vsyncpa [#allocation5 + $0x1], 1 }

</bundles_post_ra>
